<compile_context>
chip_gen: v7x
topology: tpu7x:2x2x1
jax: 0.10.0
libtpu: 0.0.40
codegen_flags: <defaults>
</compile_context>

<pallas_src>
import functools

import jax
import jax.numpy as jnp
from jax.experimental import pallas as pl
from jax.experimental.pallas import tpu as pltpu


# ----------------------------------------------------------------------------
# hardware-aware budgets
# ----------------------------------------------------------------------------

_COMPUTE_CHUNK_BYTES = 1 << 20   # per in-kernel f32 compute chunk of the gate block


def _gate_budget_and_vmem_cap():
    """(per-block edge_gate DMA budget, scoped-VMEM ceiling) for this chip."""
    try:
        cap = int(getattr(pltpu.get_tpu_info(), "vmem_capacity_bytes", 128 << 20))
    except Exception:
        cap = 128 << 20
    if cap <= (64 << 20):            # v7x-class core: 64 MiB VMEM
        return 8 << 20, 48 << 20     # 2 x 8 MiB double-buffered gate + headroom
    return 16 << 20, 100 << 20       # v5e / v6e: 128 MiB VMEM


# ----------------------------------------------------------------------------
# tile selection helpers
# ----------------------------------------------------------------------------

def _pick_tile(n, cap, mult=8):
    """Largest t <= cap with t % mult == 0 and n % t == 0; n itself if n <= cap."""
    if n <= cap:
        return n
    for t in range(min(cap, n), mult - 1, -1):
        if t % mult == 0 and n % t == 0:
            return t
    return n


def _agg_tiles(batch, num_nodes, hidden, gate_itemsize, budget, mult):
    """Pick (ti, tj, cj): row tile, gate j-block (DMA), in-kernel compute chunk."""
    # Prefer tj == N: one grid step over j (no accumulator re-streaming) and the
    # per-(b,i) gate slab becomes a single contiguous HBM segment.
    ti = None
    tj = num_nodes
    for ti_cap in (128, 64, 32, 16, 8):
        t = _pick_tile(num_nodes, ti_cap, mult)
        if t * num_nodes * hidden * gate_itemsize <= budget:
            ti = t
            break
    if ti is None:
        ti = _pick_tile(num_nodes, 128, mult)
        cap_j = max(mult, budget // max(1, ti * hidden * gate_itemsize))
        tj = _pick_tile(num_nodes, cap_j, mult)
    # v7x megacore: keep at least 2 parallel grid units when possible.
    while batch * (num_nodes // ti) < 2 and ti % (2 * mult) == 0:
        ti //= 2
    # In-kernel f32 compute chunk along j (bounds Mosaic temporaries).
    cap_c = max(mult, _COMPUTE_CHUNK_BYTES // max(1, ti * hidden * 4))
    cj = _pick_tile(tj, cap_c, mult)
    return ti, tj, cj


# ----------------------------------------------------------------------------
# kernel 1: fused U / V linear layers (single MXU pass on [U_w.T | V_w.T])
# ----------------------------------------------------------------------------

def _linear_uv_kernel(x_ref, w_ref, b_ref, ux_ref, vx_ref):
    h = ux_ref.shape[-1]
    y = jnp.dot(x_ref[...], w_ref[...], preferred_element_type=jnp.float32)
    y = y + b_ref[...]
    ux_ref[...] = y[:, :h].astype(ux_ref.dtype)
    vx_ref[...] = y[:, h:].astype(vx_ref.dtype)


def _linear_uv(x, u_w, u_b, v_w, v_b):
    B, N, H = x.shape
    M = B * N
    x2d = x.reshape(M, H)
    # One fused (H, 2H) weight / (1, 2H) bias.
    w = jnp.concatenate([u_w.T, v_w.T], axis=1).astype(x.dtype)
    b = jnp.concatenate([u_b, v_b]).reshape(1, 2 * H).astype(jnp.float32)
    tm = _pick_tile(M, 512)
    grid = (M // tm,)

    ux2d, vx2d = pl.pallas_call(
        _linear_uv_kernel,
        out_shape=(
            jax.ShapeDtypeStruct((M, H), x.dtype),
            jax.ShapeDtypeStruct((M, H), x.dtype),
        ),
        grid_spec=pltpu.PrefetchScalarGridSpec(
            num_scalar_prefetch=0,
            grid=grid,
            in_specs=[
                pl.BlockSpec((tm, H), lambda i: (i, 0)),      # x rows
                pl.BlockSpec((H, 2 * H), lambda i: (0, 0)),   # [U_w.T | V_w.T] resident
                pl.BlockSpec((1, 2 * H), lambda i: (0, 0)),   # [U_b | V_b]
            ],
            out_specs=[
                pl.BlockSpec((tm, H), lambda i: (i, 0)),
                pl.BlockSpec((tm, H), lambda i: (i, 0)),
            ],
        ),
        compiler_params=pltpu.CompilerParams(
            dimension_semantics=("parallel",)),
        cost_estimate=pl.CostEstimate(
            flops=int(4 * M * H * H),
            transcendentals=0,
            bytes_accessed=int((3 * M * H + 2 * H * H) * x.dtype.itemsize),
        ),
    )(x2d, w, b)

    return ux2d.reshape(B, N, H), vx2d.reshape(B, N, H)


# ----------------------------------------------------------------------------
# kernel 2: gated aggregation over neighbours j
# ----------------------------------------------------------------------------

def _node_agg_kernel(ux_ref, vx_ref, gate_ref, o_ref, acc_ref, gsum_ref,
                     *, mean, tj, cj):
    j = pl.program_id(2)

    @pl.when(j == 0)
    def _init():
        acc_ref[...] = jnp.zeros_like(acc_ref)
        gsum_ref[...] = jnp.zeros_like(gsum_ref)

    n_chunks = tj // cj

    # Consume the (possibly large) DMA block in small f32 chunks so the
    # elementwise/broadcast temporaries stay ~1 MiB regardless of block size.
    @pl.loop(0, n_chunks)
    def _chunk(c):
        goff = pl.multiple_of(c * cj, 8)
        g = gate_ref[0, :, pl.ds(goff, cj), :].astype(jnp.float32)       # (ti, cj, H)
        voff = pl.multiple_of(j * tj + c * cj, 8)
        v = vx_ref[0, pl.ds(voff, cj), :].astype(jnp.float32)            # (cj, H)
        acc_ref[...] += jnp.sum(g * v[None, :, :], axis=1)
        if mean:
            gsum_ref[...] += jnp.sum(g, axis=1)

    @pl.when(j == pl.num_programs(2) - 1)
    def _finalize():
        ux = ux_ref[0].astype(jnp.float32)
        if mean:
            y = ux + acc_ref[...] * pl.reciprocal(1e-20 + gsum_ref[...], approx=True)
        else:
            y = ux + acc_ref[...]
        o_ref[0] = y.astype(o_ref.dtype)


def _aggregate(ux, vx, edge_gate, aggregation):
    B, N, H = ux.shape
    budget, vmem_cap = _gate_budget_and_vmem_cap()
    gate_item = edge_gate.dtype.itemsize
    mult = 8 if gate_item >= 4 else 16
    ti, tj, cj = _agg_tiles(B, N, H, gate_item, budget, mult)
    grid = (B, N // ti, N // tj)

    # Cover the double-buffered gate stream + small resident/scratch buffers.
    gate_block_bytes = ti * tj * H * gate_item
    io_bytes = 2 * (2 * ti * H + N * H) * ux.dtype.itemsize + 2 * ti * H * 4
    vmem_limit = int(min(vmem_cap,
                         max(32 << 20, 2 * gate_block_bytes + io_bytes + (8 << 20))))

    gate_bytes = int(edge_gate.size) * gate_item
    cost = pl.CostEstimate(
        flops=int(3 * B * N * N * H),
        transcendentals=0,
        bytes_accessed=int(gate_bytes + 3 * B * N * H * ux.dtype.itemsize),
    )

    kernel = functools.partial(
        _node_agg_kernel, mean=(aggregation == "mean"), tj=tj, cj=cj)

    return pl.pallas_call(
        kernel,
        out_shape=jax.ShapeDtypeStruct((B, N, H), ux.dtype),
        grid_spec=pltpu.PrefetchScalarGridSpec(
            num_scalar_prefetch=0,
            grid=grid,
            in_specs=[
                pl.BlockSpec((1, ti, H), lambda b, i, j: (b, i, 0)),        # Ux (resident over j)
                pl.BlockSpec((1, N, H), lambda b, i, j: (b, 0, 0)),         # Vx (resident per batch)
                pl.BlockSpec((1, ti, tj, H), lambda b, i, j: (b, i, j, 0)), # edge_gate stream
            ],
            out_specs=pl.BlockSpec((1, ti, H), lambda b, i, j: (b, i, 0)),
            scratch_shapes=[
                pltpu.VMEM((ti, H), jnp.float32),   # sum_j gate * Vx
                pltpu.VMEM((ti, H), jnp.float32),   # sum_j gate
            ],
        ),
        compiler_params=pltpu.CompilerParams(
            dimension_semantics=("parallel", "parallel", "arbitrary"),
            vmem_limit_bytes=vmem_limit),
        cost_estimate=cost,
    )(ux, vx, edge_gate)


# ----------------------------------------------------------------------------
# public forward
# ----------------------------------------------------------------------------

def node_features(x, edge_gate, u_w, u_b, v_w, v_b, aggregation="mean"):
    """NodeFeatures.forward (dense path).

    Args:
      x:         (B, N, H) node features
      edge_gate: (B, N, N, H) edge gates (pass bf16 to halve HBM traffic)
      u_w, u_b:  U linear weight (H, H) PyTorch layout and bias (H,)
      v_w, v_b:  V linear weight (H, H) and bias (H,)
      aggregation: 'mean' or 'sum'
    Returns:
      (B, N, H) updated node features.
    """
    assert aggregation in ("mean", "sum")
    B, N, H = x.shape
    sub = 8 if edge_gate.dtype.itemsize >= 4 else 16
    pad = (-N) % sub
    if pad:
        # Pad N so every tile is sublane-aligned (graceful handling of awkward
        # N instead of blowing the VMEM budget with full-dim blocks).  Padded
        # gate columns are zero so real rows are unaffected; padded rows are
        # sliced off below.
        x = jnp.pad(x, ((0, 0), (0, pad), (0, 0)))
        edge_gate = jnp.pad(edge_gate, ((0, 0), (0, pad), (0, pad), (0, 0)))
    ux, vx = _linear_uv(x, u_w, u_b, v_w, v_b)
    out = _aggregate(ux, vx, edge_gate, aggregation)
    if pad:
        out = out[:, :N, :]
    return out


# ----------------------------------------------------------------------------
# pure-JAX reference + test
# ----------------------------------------------------------------------------

def _reference(x, edge_gate, u_w, u_b, v_w, v_b, aggregation="mean"):
    ux = x @ u_w.T + u_b
    vx = x @ v_w.T + v_b
    gate = edge_gate.astype(jnp.float32)
    x_add = jnp.sum(gate * vx[:, None, :, :], axis=-2)
    if aggregation == "mean":
        return ux + x_add / (1e-20 + jnp.sum(gate, axis=-2))
    return ux + x_add


if __name__ == "__main__":
    key = jax.random.PRNGKey(0)
    k_x, k_g, k_uw, k_ub, k_vw, k_vb = jax.random.split(key, 6)

    B, N, H = 2, 8, 32
    scale = 1.0 / jnp.sqrt(H)

    x = jax.random.normal(k_x, (B, N, H), dtype=jnp.float32)
    # Edge gates are sigmoid outputs in the surrounding GCN -> positive values.
    edge_gate = jax.nn.sigmoid(jax.random.normal(k_g, (B, N, N, H), dtype=jnp.float32))

    u_w = jax.random.uniform(k_uw, (H, H), jnp.float32, -scale, scale)
    u_b = jax.random.uniform(k_ub, (H,), jnp.float32, -scale, scale)
    v_w = jax.random.uniform(k_vw, (H, H), jnp.float32, -scale, scale)
    v_b = jax.random.uniform(k_vb, (H,), jnp.float32, -scale, scale)

    # mean aggregation (default)
    out = node_features(x, edge_gate, u_w, u_b, v_w, v_b, aggregation="mean")
    out = jax.block_until_ready(out)
    ref = _reference(x, edge_gate, u_w, u_b, v_w, v_b, aggregation="mean")
    assert out.shape == (B, N, H)
    # Tolerance covers MXU precision + EUP approx reciprocal in the mean path.
    assert jnp.allclose(out, ref, atol=3e-3, rtol=3e-3), "mismatch (mean) vs reference"

    # sum aggregation
    out_sum = jax.block_until_ready(
        node_features(x, edge_gate, u_w, u_b, v_w, v_b, aggregation="sum"))
    ref_sum = _reference(x, edge_gate, u_w, u_b, v_w, v_b, aggregation="sum")
    assert jnp.allclose(out_sum, ref_sum, atol=2e-3, rtol=2e-3), "mismatch (sum) vs reference"

    # bf16 edge_gate path (halved HBM traffic; f32 accumulation in-kernel)
    gate_bf16 = edge_gate.astype(jnp.bfloat16)
    out_bf16 = jax.block_until_ready(
        node_features(x, gate_bf16, u_w, u_b, v_w, v_b, aggregation="mean"))
    ref_bf16 = _reference(x, gate_bf16, u_w, u_b, v_w, v_b, aggregation="mean")
    assert jnp.allclose(out_bf16, ref_bf16, atol=5e-2, rtol=5e-2), "mismatch (bf16 gate)"

    print("KERNEL_OK")
</pallas_src>

<mosaic_0001>
module attributes {stable_mosaic.version = 11 : i64} {
  func.func @_linear_uv_kernel(%arg0: i32, %arg1: memref<16x32xf32, #tpu.memory_space<vmem>>, %arg2: memref<32x64xf32, #tpu.memory_space<vmem>>, %arg3: memref<1x64xf32, #tpu.memory_space<vmem>>, %arg4: memref<16x32xf32, #tpu.memory_space<vmem>>, %arg5: memref<16x32xf32, #tpu.memory_space<vmem>>) attributes {dimension_semantics = [#tpu.dimension_semantics<parallel>], iteration_bounds = array<i64: 1>, scalar_prefetch = 0 : i64, scratch_operands = 0 : i64, tpu.core_type = #tpu.core_type<tc>, window_params = [{transform_indices = @transform_0, window_bounds = array<i64: 16, 32>}, {pipeline_mode = #tpu.pipeline_mode<synchronous>, transform_indices = @transform_1, window_bounds = array<i64: 32, 64>}, {pipeline_mode = #tpu.pipeline_mode<synchronous>, transform_indices = @transform_2, window_bounds = array<i64: 1, 64>}, {transform_indices = @transform_3, window_bounds = array<i64: 16, 32>}, {transform_indices = @transform_4, window_bounds = array<i64: 16, 32>}]} {
    %c0 = arith.constant 0 : index
    %c0_0 = arith.constant 0 : index
    %0 = vector.load %arg1[%c0, %c0_0] : memref<16x32xf32, #tpu.memory_space<vmem>>, vector<16x32xf32>
    %c0_1 = arith.constant 0 : index
    %c0_2 = arith.constant 0 : index
    %1 = vector.load %arg2[%c0_1, %c0_2] : memref<32x64xf32, #tpu.memory_space<vmem>>, vector<32x64xf32>
    %cst = arith.constant dense<0.000000e+00> : vector<16x64xf32>
    %2 = tpu.matmul %0, %1, %cst {dimension_numbers = #tpu.dot_dimension_numbers<[1], [0], [0], [1], [0, 0, 1, 1], [], []>} : vector<16x32xf32>, vector<32x64xf32>, vector<16x64xf32> -> vector<16x64xf32>
    %c0_3 = arith.constant 0 : index
    %c0_4 = arith.constant 0 : index
    %3 = vector.load %arg3[%c0_3, %c0_4] : memref<1x64xf32, #tpu.memory_space<vmem>>, vector<1x64xf32>
    %4 = vector.broadcast %3 : vector<1x64xf32> to vector<16x64xf32>
    %5 = arith.addf %2, %4 : vector<16x64xf32>
    %6 = vector.extract_strided_slice %5 {offsets = [0, 0], sizes = [16, 32], strides = [1, 1]} : vector<16x64xf32> to vector<16x32xf32>
    %c0_5 = arith.constant 0 : index
    %c0_6 = arith.constant 0 : index
    %7 = vector.load %arg4[%c0_5, %c0_6] : memref<16x32xf32, #tpu.memory_space<vmem>>, vector<16x32xf32>
    tpu.vector_store %arg4[%c0_5, %c0_6], %6 {strides = array<i32>} : memref<16x32xf32, #tpu.memory_space<vmem>>, vector<16x32xf32>,
    %8 = vector.extract_strided_slice %5 {offsets = [0, 32], sizes = [16, 32], strides = [1, 1]} : vector<16x64xf32> to vector<16x32xf32>
    %c0_7 = arith.constant 0 : index
    %c0_8 = arith.constant 0 : index
    %9 = vector.load %arg5[%c0_7, %c0_8] : memref<16x32xf32, #tpu.memory_space<vmem>>, vector<16x32xf32>
    tpu.vector_store %arg5[%c0_7, %c0_8], %8 {strides = array<i32>} : memref<16x32xf32, #tpu.memory_space<vmem>>, vector<16x32xf32>,
    return
  }
  func.func @transform_0(%arg0: i32) -> (i32, i32) {
    %c0_i32 = arith.constant 0 : i32
    %c0_i32_0 = arith.constant 0 : i32
    return %arg0, %c0_i32 : i32, i32
  }
  func.func @transform_1(%arg0: i32) -> (i32, i32) {
    %c0_i32 = arith.constant 0 : i32
    %c0_i32_0 = arith.constant 0 : i32
    %c0_i32_1 = arith.constant 0 : i32
    return %c0_i32, %c0_i32_0 : i32, i32
  }
  func.func @transform_2(%arg0: i32) -> (i32, i32) {
    %c0_i32 = arith.constant 0 : i32
    %c0_i32_0 = arith.constant 0 : i32
    %c0_i32_1 = arith.constant 0 : i32
    return %c0_i32, %c0_i32_0 : i32, i32
  }
  func.func @transform_3(%arg0: i32) -> (i32, i32) {
    %c0_i32 = arith.constant 0 : i32
    %c0_i32_0 = arith.constant 0 : i32
    return %arg0, %c0_i32 : i32, i32
  }
  func.func @transform_4(%arg0: i32) -> (i32, i32) {
    %c0_i32 = arith.constant 0 : i32
    %c0_i32_0 = arith.constant 0 : i32
    return %arg0, %c0_i32 : i32, i32
  }
}

</mosaic_0001>

<bundles_post_ra>
// kernel: tpu_custom_call.1
= control target key start
LH: loop header
LB: loop body
LE: loop exit
PB: predicated region body
PF: predicated region fallthrough
CT: control target
= control target key end

     0   :  { %10 = vsyncpa [#allocation3], 0  ;;  %s419_s0 = inlined_call_operand.hbm [shape: f32[16,32], index: 0, kind: input, shape index: {}]   ;;  %s420_s1 = inlined_call_operand.hbm [shape: f32[32,64], index: 1, kind: input, shape index: {}]   ;;  %s421_s2 = inlined_call_operand.vmem [shape: f32[1,64], index: 2, kind: input, shape index: {}]   ;;  %s422_s3 = inlined_call_operand.hbm [shape: f32[16,32], index: 3, kind: output, shape index: {0}]   ;;  %s423_s4 = inlined_call_operand.hbm [shape: f32[16,32], index: 4, kind: output, shape index: {1}]  }
   0x1   :  { %11 = vsyncpa [#allocation6], 0 }
   0x2   :  { %12 = vsyncpa [#allocation4], 0 }
   0x3   :  { %13 = vsyncpa [#allocation9], 0  ;;  %s318_s15 = smov [#allocation2]   ;;  %s222_s19 = scalar_lea.hbm %s419_s0, 256 }
   0x4   :  { %s19_s16 = sshll.u32 %s318_s15, 4  ;;  %p223_p0 = scmp.ne.s32.totalorder %s419_s0, %s222_s19  ;;  %s20_s16 = int_to_ptr.vmem [resolvable:$true] %s19_s16 }
   0x5   :  { %p226_p1 = scmp.lt.u32.totalorder %s222_s19, %s419_s0 }
   0x7   :  { %p228_p2 = pnand %p226_p1, %p223_p0 }
   0x9   :  { %231 = shalt.err (!%p228_p2)
}
   0xa   :  { %s232_s24 = scalar_lea.vmem %s20_s16, 256  ;;  %p237_p4 = scmp.lt.s32.totalorder %s20_s16, %s20_s16 }
   0xb   :  { %p233_p3 = scmp.ne.s32.totalorder %s20_s16, %s232_s24  ;;  %p238_p5 = scmp.lt.s32.totalorder %s232_s24, %s232_s24 }
   0xd   :  { %p239_p6 = por %p238_p5, %p237_p4 }
   0xf   :  { %p240_p7 = pnand %p239_p6, %p233_p3 }
  0x11   :  { %243 = shalt.err (!%p240_p7)
}
  0x12   :  { %s319_s25 = smov 128   ;;  %s320_s26 = smov 8  }
  0x13   :  { %25 = dma.hbm_to_vmem [thread:$0]  %s419_s0, 256, %s20_s16, [#allocation3], %s319_s25, %s319_s25, %s320_s26  }
  0x14   :  { %s321_s29 = smov [#allocation5]   ;;  %s244_s7 = scalar_lea.hbm %s420_s1, 512 }
  0x15   :  { %s31_s30 = sshll.u32 %s321_s29, 4  ;;  %p245_p8 = scmp.ne.s32.totalorder %s420_s1, %s244_s7  ;;  %s32_s30 = int_to_ptr.vmem [resolvable:$true] %s31_s30 }
  0x16   :  { %p248_p9 = scmp.lt.u32.totalorder %s244_s7, %s420_s1 }
  0x18   :  { %p250_p10 = pnand %p248_p9, %p245_p8 }
  0x1a   :  { %253 = shalt.err (!%p250_p10)
}
  0x1b   :  { %s254_s12 = scalar_lea.vmem %s32_s30, 512  ;;  %p259_p12 = scmp.lt.s32.totalorder %s32_s30, %s32_s30 }
  0x1c   :  { %p255_p11 = scmp.ne.s32.totalorder %s32_s30, %s254_s12  ;;  %p260_p13 = scmp.lt.s32.totalorder %s254_s12, %s254_s12 }
  0x1e   :  { %p261_p0 = por %p260_p13, %p259_p12 }
  0x20   :  { %p262_p1 = pnand %p261_p0, %p255_p11 }
  0x22   :  { %265 = shalt.err (!%p262_p1)
}
  0x23   :  { %37 = dma.hbm_to_vmem [thread:$0]  %s420_s1, 512, %s32_s30, [#allocation6], %s319_s25, %s319_s25, %s320_s26  }
  0x24   :  { %310 = dma.done.wait [#allocation3], 256  }
  0x25   :  { %311 = vsyncadd [#allocation3], 4294967040 }
  0x26   :  { %312 = dma.done.wait [#allocation6], 512  }
  0x27   :  { %313 = vsyncadd [#allocation6], 4294966784  ;;  %vm59_vm0 = vcmask 261120   ;;  %v48_v0 = vld [vmem:[#allocation5] sm:$0xff]  ;;  %v49_v1 = vld [vmem:[#allocation5 + $0x8] sm:$0xff]  ;;  %s322_s15 = smov [#allocation7]  }
  0x28   :  { %v50_v2 = vld [vmem:[#allocation5 + $0x10] sm:$0xff]  ;;  %v207_v3 = vpack.c.bf16 %v49_v1, %v48_v0  ;;  %v51_v4 = vld [vmem:[#allocation5 + $0x18] sm:$0xff]  ;;  %s158_s16 = sshll.u32 %s322_s15, 4  ;;  %s323_s17 = smov 96   ;;  %s159_s16 = int_to_ptr.vmem [resolvable:$true] %s158_s16 }
  0x29   :  { %v46_v5 = vld [vmem:[#allocation2] sm:$0xff]  ;;  %v211_v6 = vpack.c.bf16 %v51_v4, %v50_v2  ;;  %v47_v7 = vld [vmem:[#allocation2 + $0x8] sm:$0xff]  ;;  %s266_s18 = scalar_lea.vmem %s159_s16, 256  ;;  %p271_p3 = scmp.lt.s32.totalorder %s159_s16, %s159_s16 }
  0x2a   :  { %204 = vmatprep.mubr.msk.f32.mxu0 %vm59_vm0, %v46_v5  ;;  %208 = vmatprep.subr.bf16.mxu0 %v207_v3  ;;  %v187_v8 = vld [vmem:[%s421_s2] ss:$0 sm:$0xff]  ;;  %p267_p2 = scmp.ne.s32.totalorder %s159_s16, %s266_s18  ;;  %p272_p4 = scmp.lt.s32.totalorder %s266_s18, %s266_s18 }
  0x2b   :  { %210 = vmatpush3.bf16.msra.mxu0 %v207_v3 }
  0x2c   :  { %212 = vmatprep.subr.bf16.mxu0 %v211_v6  ;;  %p273_p5 = por %p272_p4, %p271_p3 }
  0x2e   :  { %p274_p6 = pnand %p273_p5, %p267_p2 }
  0x2f   :  { %214 = vmatpush3.bf16.msra.mxu0 %v211_v6 }
  0x32   :  { %205 = vmatmul.mubr.msk.f32.vlgmr.msra.gmra.mrb[0].mxu0 %vm59_vm0, %v47_v7 }
 0x105   :  { %v206_v9 = vpop.f32.mrb[0].mxu0 }
 0x106   :  { %v138_v10 = vadd.f32 %v206_v9, %v187_v8  ;;  %v132_v11 = vpop.f32.mrb[1].mxu0 }
 0x107   :  { %v133_v12 = vadd.f32 %v187_v8, %v132_v11 }
 0x108   :  { %142 = vst.msk [vmem:[#allocation7 + $0x8] sm:$0xff] %vm59_vm0, %v138_v10 }
 0x109   :  { %141 = vst.msk [vmem:[#allocation7] sm:$0xff] %vm59_vm0, %v133_v12  ;;  %145 = vrot.lane.b32.xlu0 %v133_v12, %s323_s17 }
 0x10a   :  { %277 = shalt.err (!%p274_p6)
}
 0x10b   :  { %s278_s20 = scalar_lea.hbm %s422_s3, 256 }
 0x10c   :  { %p279_p7 = scmp.ne.s32.totalorder %s422_s3, %s278_s20  ;;  %p282_p8 = scmp.lt.u32.totalorder %s278_s20, %s422_s3 }
 0x10e   :  { %p284_p9 = pnand %p282_p8, %p279_p7 }
 0x110   :  { %287 = shalt.err (!%p284_p9)
}
 0x111   :  { %164 = dma.vmem_to_hbm [thread:$0]  %s159_s16, 256, %s422_s3, [#allocation4], %s319_s25, %s319_s25, %s320_s26  }
 0x112   :  { %147 = vrot.lane.b32.xlu0 %v138_v10, %s323_s17  ;;  %s324_s29 = smov [#allocation8]  }
 0x113   :  { %s170_s30 = sshll.u32 %s324_s29, 4  ;;  %s171_s30 = int_to_ptr.vmem [resolvable:$true] %s170_s30 }
 0x114   :  { %s288_s5 = scalar_lea.vmem %s171_s30, 256  ;;  %p293_p11 = scmp.lt.s32.totalorder %s171_s30, %s171_s30 }
 0x115   :  { %p289_p10 = scmp.ne.s32.totalorder %s171_s30, %s288_s5  ;;  %p294_p12 = scmp.lt.s32.totalorder %s288_s5, %s288_s5 }
 0x117   :  { %p295_p13 = por %p294_p12, %p293_p11 }
 0x119   :  { %p296_p0 = pnand %p295_p13, %p289_p10 }
 0x17b   :  { %v146_v13 = vpop.permute.xlu0 %145 }
 0x17c   :  { %151 = vst.msk [vmem:[#allocation8] sm:$0xff] %vm59_vm0, %v146_v13 }
 0x184   :  { %v148_v14 = vpop.permute.xlu0 %147 }
 0x185   :  { %152 = vst.msk [vmem:[#allocation8 + $0x8] sm:$0xff] %vm59_vm0, %v148_v14 }
 0x186   :  { %299 = shalt.err (!%p296_p0)
}
 0x187   :  { %s300_s3 = scalar_lea.hbm %s423_s4, 256 }
 0x188   :  { %p301_p1 = scmp.ne.s32.totalorder %s423_s4, %s300_s3  ;;  %p304_p2 = scmp.lt.u32.totalorder %s300_s3, %s423_s4 }
 0x18a   :  { %p306_p3 = pnand %p304_p2, %p301_p1 }
 0x18c   :  { %309 = shalt.err (!%p306_p3)
}
 0x18d   :  { %176 = dma.vmem_to_hbm [thread:$0]  %s171_s30, 256, %s423_s4, [#allocation9], %s319_s25, %s319_s25, %s320_s26  }
 0x18e   :  { %314 = dma.done.wait [#allocation4], 256  }
 0x18f   :  { %315 = vsyncadd [#allocation4], 4294967040 }
 0x190   :  { %316 = dma.done.wait [#allocation9], 256  }
 0x191   :  { %317 = vsyncadd [#allocation9], 4294967040 }
 0x192   :  { %183 = vsyncpa [#allocation3], 1 }
 0x193   :  { %184 = vsyncpa [#allocation6], 1 }
 0x194   :  { %185 = vsyncpa [#allocation4], 1 }
 0x195   :  { %186 = vsyncpa [#allocation9], 1 }

</bundles_post_ra>
